<compile_context>
chip_gen: v7x
topology: tpu7x:2x2x1
jax: 0.10.0
libtpu: 0.0.40
codegen_flags: <defaults>
</compile_context>

<pallas_src>
import jax
import jax.numpy as jnp
from jax.experimental import pallas as pl
from jax.experimental.pallas import tpu as pltpu
import math


def _nin_kernel(x_ref, wT_ref, b_ref, o_ref):
    # x_ref : (1, C, TS)   wT_ref : (O, C)   b_ref : (O, 1)   o_ref : (1, O, TS)
    x = x_ref[0]                                                   # (C, TS)
    acc = jnp.dot(wT_ref[...], x, preferred_element_type=jnp.float32)  # (O, TS)
    o_ref[0] = (acc + b_ref[...]).astype(o_ref.dtype)


def _pick_spatial_tile(S):
    """Lane tile: a multiple of 128 that divides S (prefer >=512), else full S."""
    for ts in (2048, 1024, 512, 256, 128):
        if S % ts == 0:
            return ts
    return S  # full-extent block is also legal under the (8,128) rule


@jax.jit
def nin_forward(x_nchw, W, b):
    """NIN forward. x_nchw: (B, C, H, W); W: (C, O); b: (O,). Returns (B, O, H, W)."""
    B, C, H, Wd = x_nchw.shape
    O = W.shape[1]
    S = H * Wd
    TS = _pick_spatial_tile(S)

    # NCHW -> (B, C, S): pure reshape (no data movement).  Tiny param prep.
    x3d = x_nchw.reshape(B, C, S)
    wT = W.T                      # (O, C) -- 32 elements, negligible
    b2d = b.reshape(O, 1)

    cost = pl.CostEstimate(
        flops=2 * B * S * C * O,
        transcendentals=0,
        bytes_accessed=4 * (B * C * S + C * O + O + B * O * S),
    )

    out3d = pl.pallas_call(
        _nin_kernel,
        out_shape=jax.ShapeDtypeStruct((B, O, S), x_nchw.dtype),
        grid_spec=pltpu.PrefetchScalarGridSpec(
            num_scalar_prefetch=0,
            grid=(B, S // TS),
            in_specs=[
                pl.BlockSpec((1, C, TS), lambda bi, si: (bi, 0, si)),  # x tile, streams
                pl.BlockSpec((O, C), lambda bi, si: (0, 0)),            # W^T, resident
                pl.BlockSpec((O, 1), lambda bi, si: (0, 0)),            # bias, resident
            ],
            out_specs=pl.BlockSpec((1, O, TS), lambda bi, si: (bi, 0, si)),
        ),
        compiler_params=pltpu.CompilerParams(
            dimension_semantics=("parallel", "parallel"),
            # Tiles are small (C, O tiny); 32 MiB scoped VMEM is plenty on
            # v5e / v6e / v7x even with double buffering.
            vmem_limit_bytes=32 << 20,
        ),
        cost_estimate=cost,
    )(x3d, wT, b2d)

    # (B, O, S) -> (B, O, H, W): pure reshape, no transpose.
    return out3d.reshape(B, O, H, Wd)


def default_init_uniform(key, shape, scale=0.1):
    """Reproduce variance_scaling(scale, 'fan_avg', 'uniform') for a 2-D (in_dim, num_units) weight."""
    scale = 1e-10 if scale == 0 else scale
    # For shape (in_dim, num_units) with in_axis=1, out_axis=0:
    #   receptive_field_size = 1, fan_in = shape[1], fan_out = shape[0]
    fan_in, fan_out = shape[1], shape[0]
    denominator = (fan_in + fan_out) / 2.0
    variance = scale / denominator
    limit = math.sqrt(3.0 * variance)
    return jax.random.uniform(key, shape, dtype=jnp.float32,
                              minval=-limit, maxval=limit)


if __name__ == "__main__":
    key = jax.random.PRNGKey(0)
    k_x, k_w = jax.random.split(key)

    B, C, H, Wd = 2, 4, 16, 16
    O = 8  # num_units

    x = jax.random.normal(k_x, (B, C, H, Wd), dtype=jnp.float32)
    W = default_init_uniform(k_w, (C, O), scale=0.1)
    b = jnp.zeros((O,), dtype=jnp.float32)

    out = nin_forward(x, W, b)
    jax.block_until_ready(out)

    # Reference check against plain-JAX einsum (same math as the torch module).
    ref = jnp.einsum("bchw,co->bohw", x, W) + b.reshape(1, O, 1, 1)
    assert out.shape == (B, O, H, Wd)
    assert jnp.allclose(out, ref, atol=1e-5, rtol=1e-5)

    print("KERNEL_OK")
</pallas_src>

<mosaic_0001>
module attributes {stable_mosaic.version = 11 : i64} {
  func.func @_nin_kernel(%arg0: i32, %arg1: i32, %arg2: memref<1x4x256xf32, #tpu.memory_space<vmem>>, %arg3: memref<8x4xf32, #tpu.memory_space<vmem>>, %arg4: memref<8x1xf32, #tpu.memory_space<vmem>>, %arg5: memref<1x8x256xf32, #tpu.memory_space<vmem>>) attributes {dimension_semantics = [#tpu.dimension_semantics<parallel>, #tpu.dimension_semantics<parallel>], iteration_bounds = array<i64: 2, 1>, scalar_prefetch = 0 : i64, scratch_operands = 0 : i64, tpu.core_type = #tpu.core_type<tc>, window_params = [{transform_indices = @transform_0, window_bounds = array<i64: 1, 4, 256>}, {pipeline_mode = #tpu.pipeline_mode<synchronous>, transform_indices = @transform_1, window_bounds = array<i64: 8, 4>}, {pipeline_mode = #tpu.pipeline_mode<synchronous>, transform_indices = @transform_2, window_bounds = array<i64: 8, 1>}, {transform_indices = @transform_3, window_bounds = array<i64: 1, 8, 256>}]} {
    %c0 = arith.constant 0 : index
    %c0_0 = arith.constant 0 : index
    %c0_1 = arith.constant 0 : index
    %0 = vector.load %arg2[%c0, %c0_0, %c0_1] : memref<1x4x256xf32, #tpu.memory_space<vmem>>, vector<1x4x256xf32>
    %1 = vector.shape_cast %0 : vector<1x4x256xf32> to vector<4x256xf32>
    %c0_2 = arith.constant 0 : index
    %c0_3 = arith.constant 0 : index
    %2 = vector.load %arg3[%c0_2, %c0_3] : memref<8x4xf32, #tpu.memory_space<vmem>>, vector<8x4xf32>
    %cst = arith.constant dense<0.000000e+00> : vector<8x256xf32>
    %3 = tpu.matmul %2, %1, %cst {dimension_numbers = #tpu.dot_dimension_numbers<[1], [0], [0], [1], [0, 0, 1, 1], [], []>} : vector<8x4xf32>, vector<4x256xf32>, vector<8x256xf32> -> vector<8x256xf32>
    %c0_4 = arith.constant 0 : index
    %c0_5 = arith.constant 0 : index
    %4 = vector.load %arg4[%c0_4, %c0_5] : memref<8x1xf32, #tpu.memory_space<vmem>>, vector<8x1xf32>
    %5 = vector.broadcast %4 : vector<8x1xf32> to vector<8x256xf32>
    %6 = arith.addf %3, %5 : vector<8x256xf32>
    %c0_6 = arith.constant 0 : index
    %c0_7 = arith.constant 0 : index
    %c0_8 = arith.constant 0 : index
    %7 = vector.load %arg5[%c0_6, %c0_7, %c0_8] : memref<1x8x256xf32, #tpu.memory_space<vmem>>, vector<1x8x256xf32>
    %8 = vector.shape_cast %7 : vector<1x8x256xf32> to vector<8x256xf32>
    %9 = vector.shape_cast %6 : vector<8x256xf32> to vector<1x8x256xf32>
    tpu.vector_store %arg5[%c0_6, %c0_7, %c0_8], %9 {strides = array<i32>} : memref<1x8x256xf32, #tpu.memory_space<vmem>>, vector<1x8x256xf32>,
    return
  }
  func.func @transform_0(%arg0: i32, %arg1: i32) -> (i32, i32, i32) {
    %c0_i32 = arith.constant 0 : i32
    %c0_i32_0 = arith.constant 0 : i32
    return %arg0, %c0_i32, %arg1 : i32, i32, i32
  }
  func.func @transform_1(%arg0: i32, %arg1: i32) -> (i32, i32) {
    %c0_i32 = arith.constant 0 : i32
    %c0_i32_0 = arith.constant 0 : i32
    %c0_i32_1 = arith.constant 0 : i32
    return %c0_i32, %c0_i32_0 : i32, i32
  }
  func.func @transform_2(%arg0: i32, %arg1: i32) -> (i32, i32) {
    %c0_i32 = arith.constant 0 : i32
    %c0_i32_0 = arith.constant 0 : i32
    %c0_i32_1 = arith.constant 0 : i32
    return %c0_i32, %c0_i32_0 : i32, i32
  }
  func.func @transform_3(%arg0: i32, %arg1: i32) -> (i32, i32, i32) {
    %c0_i32 = arith.constant 0 : i32
    %c0_i32_0 = arith.constant 0 : i32
    return %arg0, %c0_i32, %arg1 : i32, i32, i32
  }
}

</mosaic_0001>

<bundles_post_ra>
// kernel: nin_forward.1
= control target key start
LH: loop header
LB: loop body
LE: loop exit
PB: predicated region body
PF: predicated region fallthrough
CT: control target
= control target key end

     0   :  { %s479_s12 = smov 0   ;;  %s481_s13 = smov 0   ;;  %s518_s0 = inlined_call_operand.vmem [shape: f32[2,4,256], index: 0, kind: input, shape index: {}]   ;;  %s519_s1 = inlined_call_operand.vmem [shape: f32[8,4], index: 1, kind: input, shape index: {}]   ;;  %s520_s2 = inlined_call_operand.vmem [shape: f32[8,1], index: 2, kind: input, shape index: {}]   ;;  %s521_s3 = inlined_call_operand.vmem [shape: f32[2,8,256], index: 3, kind: output, shape index: {}]  }
   0x1   :  { %s483_s14 = smov 0  }
   0x2 LB: > { %s25_s15 = sadd.s32 1, %s451_s13  ;;  %p393_p0 = scmp.ge.s32.totalorder %s455_s14, 1  ;;  %s455_s14 = sphi %s483_s14, %s13_s14   ;;  %s451_s13 = sphi %s481_s13, %s523_s13   ;;  %s447_s12 = sphi %s479_s12, %s522_s12  }
   0x3   : > { %p27_p1 = scmp.ge.s32.totalorder %s25_s15, 2  ;;  %p158_p2 = scmp.lt.s32.totalorder %s455_s14, 3 }
   0x5   : > { %s525_s15 = smov (%p27_p1, %s25_s15), 0  ;;  %p159_p3 = pnand %p393_p0, %p158_p2 }
   0x6   : > { %p191_p4 = scmp.lt.s32.totalorder (!%p159_p3), %s447_s12, 1  ;;  %v457_v0 = vmov (!%p159_p3), 0.0   ;;  %v458_v1 = vmov (!%p159_p3), 0   ;;  %v212_v2 = vld [vmem:[%s520_s2] sm:$0xff] (!%p159_p3)  ;;  %vm224_vm0 = vcmask (!%p159_p3), 1043456   ;;  %vm220_vm1 = vcmask (!%p159_p3), 31744  }
   0x7   : > { %162 = sbr.rel (%p159_p3) target bundleno = 238 (0xee), region = 32  ;;  %293 = vmatprep.mubr.f32.mxu0 (!%p159_p3), %v457_v0  ;;  %431 = vset.pattern.permute.xlu0 (!%p159_p3), %v458_v1  ;;  %v211_v5 = vld [vmem:[%s519_s1] sm:$0xff] (!%p159_p3) }
   0x8   : > { %215 = vperm.xlu0 (!%p159_p3), %431, %v212_v2  }
   0xe   : > { %s527_s12 = smov (!%p191_p4, %s447_s12), 1 }
   0xf   : > { %s403_s18 = sshll.u32 %s527_s12, 3  ;;  %s404_s24 = sshll.u32 %s527_s12, 4 }
  0x10   : > { %s198_s21 = scalar_lea.vmem %s518_s0, %s403_s18  ;;  %s208_s27 = scalar_lea.vmem %s521_s3, %s404_s24 }
  0x11   : > { %v210_v3 = vld [vmem:[%s198_s21] sm:$0xff] }
  0x12   : > { %v219_v4 = vcombine.high %v210_v3, %v210_v3 }
  0x14   : > { %398 = vmatprep.subr.msk.mxu0 %vm224_vm0, %v219_v4 }
  0x15   : > { %399 = vmatpush1.msk.msra.mxu0 %vm224_vm0, %v210_v3 }
  0x16   : > { %400 = vmatmul.mubr.msk.f32.vlgmr.msra.gmra.mrb[0].mxu0 %vm220_vm1, %v211_v5 }
  0x87   : > { %v216_v6 = vpop.permute.xlu0 %215 }
  0xe9   : > { %v295_v7 = vpop.f32.mrb[0].mxu0 }
  0xea   : > { %v296_v8 = vadd.f32 %v295_v7, %v216_v6  ;;  %v297_v9 = vpop.f32.mrb[1].mxu0 }
  0xeb   : > { %v298_v10 = vadd.f32 %v297_v9, %v216_v6 }
  0xec   : > { %300 = vst [vmem:[%s208_s27] sm:$0xff] %v296_v8 }
  0xed   : > { %301 = vst [vmem:[%s208_s27 + $0x8] sm:$0xff] %v298_v10 }
  0xee PF: > { %s13_s14 = sadd.s32 1, %s455_s14   ;;  %s522_s12 = smov %s451_s13 }
  0xef   : > { %p10_p5 = scmp.ge.s32.totalorder %s13_s14, 4   ;;  %s523_s13 = smov %s525_s15 }
  0xf1   :  { %12 = sbr.rel (!%p10_p5) target bundleno = 2 (0x2), region = 62 }

</bundles_post_ra>
